<compile_context>
chip_gen: v5e
topology: v5e:2x2
jax: 0.10.0
libtpu: 0.0.40
codegen_flags: <defaults>
</compile_context>

<pallas_src>
import functools

import jax
import jax.numpy as jnp
from jax.experimental import pallas as pl
from jax.experimental.pallas import tpu as pltpu
import numpy as np


def _round_up(x, m):
    return (x + m - 1) // m * m


def gcn_kernel(a_ref, x_ref, w1_ref, b1_ref, w2_ref, b2_ref, o_ref):
    # ---- layer 1: GCNConv(in, hidden) as (A @ X) @ W1 + b1 -----------------
    # (bf16 MXU operands, f32 accumulation; association is perf-neutral at
    #  this size since all output widths round up to one 128-lane tile).
    ax = jnp.dot(a_ref[...], x_ref[...],
                 preferred_element_type=jnp.float32)              # [Np, Cin] f32
    h = jnp.dot(ax, w1_ref[...],
                preferred_element_type=jnp.float32) + b1_ref[...]  # [Np, H] f32

    # ---- ReLU (f32 VPU math; required on v5e, fine everywhere) -------------
    h = jnp.maximum(h, 0.0)

    # ---- layer 2: GCNConv(hidden, out) as A @ (h @ W2) + b2, all f32 -------
    # No bf16 round-trip of the accumulated intermediate (accuracy is free;
    # the kernel is launch-bound, not MXU-bound, at this size).
    hw = jnp.dot(h, w2_ref[...], preferred_element_type=jnp.float32)  # [Np, Cpad]
    o_ref[...] = (
        jnp.dot(a_ref[...].astype(jnp.float32), hw,
                preferred_element_type=jnp.float32)
        + b2_ref[...]
    )


def prepare_gcn_operands(a_hat, w2, b2):
    """One-time padding/casting of graph & parameter constants.

    Hoisted out of the forward path so the per-call work is just the x pad
    (fused under jit) and the pallas_call itself.
    """
    n = a_hat.shape[0]
    c_out = w2.shape[1]
    n_pad = _round_up(n, 128)      # sublane + MXU alignment of the node axis
    c_pad = _round_up(c_out, 128)  # lane-dense output (unmasked vst)

    # Zero padding outside the real graph keeps the math exact for the first
    # n rows (padded columns of A are zero -> padded rows of h never reach
    # real outputs).
    a_p = (
        jnp.zeros((n_pad, n_pad), jnp.bfloat16)
        .at[:n, :n].set(a_hat.astype(jnp.bfloat16))
    )
    w2_p = jnp.zeros((w2.shape[0], c_pad), jnp.float32).at[:, :c_out].set(w2)
    b2_p = jnp.zeros((1, c_pad), jnp.float32).at[:, :c_out].set(b2)
    return a_p, w2_p, b2_p


@functools.partial(jax.jit, static_argnames=("c_out",))
def simple_gcn(a_p, x, w1, b1, w2_p, b2_p, *, c_out):
    """Jitted forward: pad/cast x, run the Pallas kernel, slice the output.

    All three steps live inside one jit so XLA fuses the glue around the
    single pallas_call (no standalone pad / slice dispatches).
    """
    n, c_in = x.shape
    n_pad = a_p.shape[0]
    c_pad = w2_p.shape[1]

    x_p = (
        jnp.zeros((n_pad, c_in), jnp.bfloat16)
        .at[:n, :].set(x.astype(jnp.bfloat16))
    )

    flops = 2 * (
        n_pad * n_pad * c_in            # A @ X
        + n_pad * c_in * w1.shape[1]    # (A@X) @ W1
        + n_pad * w1.shape[1] * c_pad   # h @ W2
        + n_pad * n_pad * c_pad         # A @ (h@W2)
    )
    bytes_accessed = (
        a_p.size * 2 + x_p.size * 2
        + w1.size * 4 + b1.size * 4 + w2_p.size * 4 + b2_p.size * 4
        + n_pad * c_pad * 4
    )

    vmem = pl.BlockSpec(memory_space=pltpu.MemorySpace.VMEM)
    out_p = pl.pallas_call(
        gcn_kernel,
        out_shape=jax.ShapeDtypeStruct((n_pad, c_pad), jnp.float32),
        in_specs=[vmem] * 6,
        out_specs=vmem,
        cost_estimate=pl.CostEstimate(
            flops=flops, transcendentals=0, bytes_accessed=bytes_accessed
        ),
    )(a_p, x_p, w1, b1, w2_p, b2_p)

    # Slice fuses with the surrounding jit — no separate dispatch.
    return out_p[:n, :c_out]


def build_poly_edge_index(sizes):
    """Each block of `sizes` forms a cycle (polygon); edges made undirected."""
    rows, cols = [], []
    offset = 0
    for s in sizes:
        idx = np.arange(s)
        rows.append(offset + idx)
        cols.append(offset + (idx + 1) % s)
        offset += s
    row = np.concatenate(rows)
    col = np.concatenate(cols)
    row_full = np.concatenate([row, col])
    col_full = np.concatenate([col, row])
    return np.stack([row_full, col_full], axis=0)  # (2, E)


def normalized_adjacency(edge_index, num_nodes):
    """Dense D^-1/2 (A + I) D^-1/2, matching GCNConv's symmetric norm."""
    row, col = edge_index
    a = jnp.zeros((num_nodes, num_nodes), jnp.float32)
    a = a.at[row, col].add(1.0)
    a = a + jnp.eye(num_nodes, dtype=jnp.float32)  # self loops
    deg = a.sum(axis=1)
    d_inv_sqrt = jnp.where(deg > 0, 1.0 / jnp.sqrt(deg), 0.0)
    return d_inv_sqrt[:, None] * a * d_inv_sqrt[None, :]


if __name__ == "__main__":
    sizes = [30, 30, 40]
    num_nodes = sum(sizes)              # 100
    in_channels = 4
    hidden_channels = 16
    out_channels = 8

    key = jax.random.PRNGKey(0)
    k_x, k_w1, k_w2 = jax.random.split(key, 3)

    # Node features (num_nodes, in_channels) — mirrors torch.randn(num_nodes, 4)
    x = jax.random.normal(k_x, (num_nodes, in_channels), dtype=jnp.float32)

    # Graph + normalized dense adjacency (glue, plain JAX)
    edge_index = build_poly_edge_index(sizes)
    a_hat = normalized_adjacency(jnp.asarray(edge_index), num_nodes)

    # Deterministic GCNConv parameters (glorot-style weights, zero biases)
    def glorot(k, fan_in, fan_out):
        lim = jnp.sqrt(6.0 / (fan_in + fan_out))
        return jax.random.uniform(
            k, (fan_in, fan_out), jnp.float32, minval=-lim, maxval=lim
        )

    w1 = glorot(k_w1, in_channels, hidden_channels)
    b1 = jnp.zeros((1, hidden_channels), jnp.float32)
    w2 = glorot(k_w2, hidden_channels, out_channels)
    b2 = jnp.zeros((1, out_channels), jnp.float32)

    # One-time constant prep (hoisted out of the hot path).
    a_p, w2_p, b2_p = prepare_gcn_operands(a_hat, w2, b2)

    out = simple_gcn(a_p, x, w1, b1, w2_p, b2_p, c_out=out_channels)
    out = jax.block_until_ready(out)

    # --- sanity check 1: bitwise-faithful reference (same bf16 rounding of A
    # and X as the kernel's layer-1 MXU inputs; everything else f32).
    a_q = a_hat.astype(jnp.bfloat16).astype(jnp.float32)
    x_q = x.astype(jnp.bfloat16).astype(jnp.float32)
    h_ref = jnp.maximum((a_q @ x_q) @ w1 + b1, 0.0)
    ref_bf = a_q @ (h_ref @ w2) + b2
    np.testing.assert_allclose(
        np.asarray(out), np.asarray(ref_bf), rtol=1e-4, atol=1e-4
    )

    # --- sanity check 2: vs pure f32 module semantics.  Tolerance tightened
    # (5e-2 -> 2e-2) now that layer 2 has no bf16 round-trip; remaining error
    # comes only from bf16 storage of A_hat / x.
    h_f32 = jnp.maximum(a_hat @ (x @ w1) + b1, 0.0)
    ref_f32 = a_hat @ (h_f32 @ w2) + b2
    np.testing.assert_allclose(
        np.asarray(out), np.asarray(ref_f32), rtol=2e-2, atol=2e-2
    )

    print("KERNEL_OK")
</pallas_src>

<mosaic_0001>
module attributes {stable_mosaic.version = 11 : i64} {
  func.func @gcn_kernel(%arg0: memref<128x128xbf16, #tpu.memory_space<vmem>>, %arg1: memref<128x4xbf16, #tpu.memory_space<vmem>>, %arg2: memref<4x16xf32, #tpu.memory_space<vmem>>, %arg3: memref<1x16xf32, #tpu.memory_space<vmem>>, %arg4: memref<16x128xf32, #tpu.memory_space<vmem>>, %arg5: memref<1x128xf32, #tpu.memory_space<vmem>>, %arg6: memref<128x128xf32, #tpu.memory_space<vmem>>) attributes {dimension_semantics = [], scalar_prefetch = 0 : i64, scratch_operands = 0 : i64, tpu.core_type = #tpu.core_type<tc>} {
    %c0 = arith.constant 0 : index
    %c0_0 = arith.constant 0 : index
    %0 = vector.load %arg0[%c0, %c0_0] : memref<128x128xbf16, #tpu.memory_space<vmem>>, vector<128x128xbf16>
    %c0_1 = arith.constant 0 : index
    %c0_2 = arith.constant 0 : index
    %1 = vector.load %arg1[%c0_1, %c0_2] : memref<128x4xbf16, #tpu.memory_space<vmem>>, vector<128x4xbf16>
    %cst = arith.constant dense<0.000000e+00> : vector<128x4xf32>
    %2 = tpu.matmul %0, %1, %cst {dimension_numbers = #tpu.dot_dimension_numbers<[1], [0], [0], [1], [0, 0, 1, 1], [], []>} : vector<128x128xbf16>, vector<128x4xbf16>, vector<128x4xf32> -> vector<128x4xf32>
    %c0_3 = arith.constant 0 : index
    %c0_4 = arith.constant 0 : index
    %3 = vector.load %arg2[%c0_3, %c0_4] : memref<4x16xf32, #tpu.memory_space<vmem>>, vector<4x16xf32>
    %cst_5 = arith.constant dense<0.000000e+00> : vector<128x16xf32>
    %4 = tpu.matmul %2, %3, %cst_5 {dimension_numbers = #tpu.dot_dimension_numbers<[1], [0], [0], [1], [0, 0, 1, 1], [], []>} : vector<128x4xf32>, vector<4x16xf32>, vector<128x16xf32> -> vector<128x16xf32>
    %c0_6 = arith.constant 0 : index
    %c0_7 = arith.constant 0 : index
    %5 = vector.load %arg3[%c0_6, %c0_7] : memref<1x16xf32, #tpu.memory_space<vmem>>, vector<1x16xf32>
    %6 = vector.broadcast %5 : vector<1x16xf32> to vector<128x16xf32>
    %7 = arith.addf %4, %6 : vector<128x16xf32>
    %cst_8 = arith.constant 0.000000e+00 : f32
    %8 = vector.broadcast %cst_8 : f32 to vector<128x16xf32>
    %9 = arith.maximumf %7, %8 : vector<128x16xf32>
    %c0_9 = arith.constant 0 : index
    %c0_10 = arith.constant 0 : index
    %10 = vector.load %arg4[%c0_9, %c0_10] : memref<16x128xf32, #tpu.memory_space<vmem>>, vector<16x128xf32>
    %cst_11 = arith.constant dense<0.000000e+00> : vector<128x128xf32>
    %11 = tpu.matmul %9, %10, %cst_11 {dimension_numbers = #tpu.dot_dimension_numbers<[1], [0], [0], [1], [0, 0, 1, 1], [], []>} : vector<128x16xf32>, vector<16x128xf32>, vector<128x128xf32> -> vector<128x128xf32>
    %c0_12 = arith.constant 0 : index
    %c0_13 = arith.constant 0 : index
    %12 = vector.load %arg0[%c0_12, %c0_13] : memref<128x128xbf16, #tpu.memory_space<vmem>>, vector<128x128xbf16>
    %13 = arith.extf %12 : vector<128x128xbf16> to vector<128x128xf32>
    %cst_14 = arith.constant dense<0.000000e+00> : vector<128x128xf32>
    %14 = tpu.matmul %13, %11, %cst_14 {dimension_numbers = #tpu.dot_dimension_numbers<[1], [0], [0], [1], [0, 0, 1, 1], [], []>} : vector<128x128xf32>, vector<128x128xf32>, vector<128x128xf32> -> vector<128x128xf32>
    %c0_15 = arith.constant 0 : index
    %c0_16 = arith.constant 0 : index
    %15 = vector.load %arg5[%c0_15, %c0_16] : memref<1x128xf32, #tpu.memory_space<vmem>>, vector<1x128xf32>
    %16 = vector.broadcast %15 : vector<1x128xf32> to vector<128x128xf32>
    %17 = arith.addf %14, %16 : vector<128x128xf32>
    %c0_17 = arith.constant 0 : index
    %c0_18 = arith.constant 0 : index
    %18 = vector.load %arg6[%c0_17, %c0_18] : memref<128x128xf32, #tpu.memory_space<vmem>>, vector<128x128xf32>
    tpu.vector_store %arg6[%c0_17, %c0_18], %17 {strides = array<i32>} : memref<128x128xf32, #tpu.memory_space<vmem>>, vector<128x128xf32>,
    return
  }
}

</mosaic_0001>

<bundles_post_ra>
// kernel: simple_gcn.1
= control target key start
LH: loop header
LB: loop body
LE: loop exit
PB: predicated region body
PF: predicated region fallthrough
CT: control target
= control target key end

     0   :  { %vm254_vm0 = vcmask 1043456   ;;  %vm205_vm1 = vcmask 31744   ;;  %vm341_vm2 = vcmask 130048   ;;  %s895_s1 = inlined_call_operand.vmem [shape: bf16[128,4], index: 1, kind: input, shape index: {}]   ;;  %s896_s0 = inlined_call_operand.vmem [shape: bf16[128,128], index: 0, kind: input, shape index: {}]   ;;  %s897_s2 = inlined_call_operand.vmem [shape: f32[4,16], index: 2, kind: input, shape index: {}]   ;;  %s898_s3 = inlined_call_operand.vmem [shape: f32[1,16], index: 3, kind: input, shape index: {}]   ;;  %s899_s4 = inlined_call_operand.vmem [shape: f32[16,128], index: 4, kind: input, shape index: {}]   ;;  %s900_s5 = inlined_call_operand.vmem [shape: f32[1,128], index: 5, kind: input, shape index: {}]   ;;  %s901_s6 = inlined_call_operand.vmem [shape: f32[128,128], index: 6, kind: output, shape index: {}]  }
   0x1   :  { %v672_v0 = vld [vmem:[%s895_s1 + $0x38] sm:$0xff]  ;;  %v671_v1 = vld [vmem:[%s895_s1 + $0x30] sm:$0xff]  ;;  %v670_v2 = vld [vmem:[%s895_s1 + $0x28] sm:$0xff] }
   0x2   :  { %151 = vmatpush.bf16.msra.mxu0 %v672_v0  ;;  %v669_v3 = vld [vmem:[%s895_s1 + $0x20] sm:$0xff]  ;;  %v668_v4 = vld [vmem:[%s895_s1 + $0x18] sm:$0xff]  ;;  %v667_v5 = vld [vmem:[%s895_s1 + $0x10] sm:$0xff] }
   0x3   :  { %v666_v6 = vld [vmem:[%s895_s1 + $0x8] sm:$0xff]  ;;  %v665_v7 = vld [vmem:[%s895_s1] sm:$0xff]  ;;  %v659_v10 = vld [vmem:[%s896_s0 + $0x10] sm:$0xff] }
   0x4   :  { %v657_v8 = vld [vmem:[%s896_s0] sm:$0xff]  ;;  %v658_v9 = vld [vmem:[%s896_s0 + $0x8] sm:$0xff]  ;;  %v660_v11 = vld [vmem:[%s896_s0 + $0x18] sm:$0xff] }
   0x5   :  { %v661_v12 = vld [vmem:[%s896_s0 + $0x20] sm:$0xff]  ;;  %v662_v13 = vld [vmem:[%s896_s0 + $0x28] sm:$0xff]  ;;  %v663_v14 = vld [vmem:[%s896_s0 + $0x30] sm:$0xff] }
   0x6   :  { %152 = vmatpush.bf16.msra.mxu0 %v671_v1  ;;  %v200_v15 = vld [vmem:[%s897_s2] sm:$0xf]  ;;  %v664_v16 = vld [vmem:[%s896_s0 + $0x38] sm:$0xff]  ;;  %v340_v29 = vld [vmem:[%s899_s4 + $0x8] sm:$0xff] }
   0x7   :  { %624 = vmatpush.msk.msra.mxu1 %vm254_vm0, %v200_v15  ;;  %404 = vmatpush.msra.mxu2 %v340_v29  ;;  %v339_v31 = vld [vmem:[%s899_s4] sm:$0xff] }
   0x8   :  { %v786_v35 = vld [vmem:[%s898_s3] ss:$0 sm:$0xff] }
   0x9   :  { %405 = vmatpush.msra.mxu2 %v339_v31 }
   0xa   :  { %153 = vmatpush.bf16.msra.mxu0 %v670_v2 }
   0xe   :  { %154 = vmatpush.bf16.msra.mxu0 %v669_v3 }
  0x12   :  { %155 = vmatpush.bf16.msra.mxu0 %v668_v4 }
  0x16   :  { %156 = vmatpush.bf16.msra.mxu0 %v667_v5 }
  0x1a   :  { %157 = vmatpush.bf16.msra.mxu0 %v666_v6 }
  0x1e   :  { %158 = vmatpush.bf16.msra.mxu0 %v665_v7 }
  0x21   :  { %159 = vmatmul.bf16.vlgmr.msra.gmra.mxu0 %v657_v8 }
  0x31   :  { %164 = vmatmul.bf16.gmra.mxu0 %v658_v9 }
  0x41   :  { %169 = vmatmul.bf16.gmra.mxu0 %v659_v10 }
  0x51   :  { %174 = vmatmul.bf16.gmra.mxu0 %v660_v11 }
  0x61   :  { %179 = vmatmul.bf16.gmra.mxu0 %v661_v12 }
  0x71   :  { %184 = vmatmul.bf16.gmra.mxu0 %v662_v13 }
  0x81   :  { %189 = vmatmul.bf16.gmra.mxu0 %v663_v14 }
  0x91   :  { %194 = vmatmul.bf16.gmra.mxu0 %v664_v16 }
  0x9e   :  { %v160_v17 = vpop.f32.mrf.mxu0 }
  0x9f   :  { %625 = vmatmul.msk.f32.vlgmr.msra.gmra.mxu1 %vm205_vm1, %v160_v17 }
  0xa6   :  { %v162_v18 = vpop.f32.mrf.mxu0 }
  0xa7   :  { %626 = vmatmul.msk.f32.gmra.mxu1 %vm205_vm1, %v162_v18 }
  0xae   :  { %v165_v19 = vpop.f32.mrf.mxu0 }
  0xaf   :  { %627 = vmatmul.msk.f32.gmra.mxu1 %vm205_vm1, %v165_v19 }
  0xb6   :  { %v167_v20 = vpop.f32.mrf.mxu0 }
  0xb7   :  { %628 = vmatmul.msk.f32.gmra.mxu1 %vm205_vm1, %v167_v20 }
  0xbe   :  { %v170_v21 = vpop.f32.mrf.mxu0 }
  0xbf   :  { %629 = vmatmul.msk.f32.gmra.mxu1 %vm205_vm1, %v170_v21 }
  0xc6   :  { %v172_v22 = vpop.f32.mrf.mxu0 }
  0xc7   :  { %630 = vmatmul.msk.f32.gmra.mxu1 %vm205_vm1, %v172_v22 }
  0xce   :  { %v175_v23 = vpop.f32.mrf.mxu0 }
  0xcf   :  { %631 = vmatmul.msk.f32.gmra.mxu1 %vm205_vm1, %v175_v23 }
  0xd6   :  { %v177_v24 = vpop.f32.mrf.mxu0 }
  0xd7   :  { %632 = vmatmul.msk.f32.gmra.mxu1 %vm205_vm1, %v177_v24 }
  0xde   :  { %v180_v25 = vpop.f32.mrf.mxu0 }
  0xdf   :  { %633 = vmatmul.msk.f32.gmra.mxu1 %vm205_vm1, %v180_v25 }
  0xe6   :  { %v182_v26 = vpop.f32.mrf.mxu0 }
  0xe7   :  { %634 = vmatmul.msk.f32.gmra.mxu1 %vm205_vm1, %v182_v26 }
  0xee   :  { %v185_v27 = vpop.f32.mrf.mxu0 }
  0xef   :  { %635 = vmatmul.msk.f32.gmra.mxu1 %vm205_vm1, %v185_v27 }
  0xf6   :  { %v187_v28 = vpop.f32.mrf.mxu0 }
  0xf7   :  { %636 = vmatmul.msk.f32.gmra.mxu1 %vm205_vm1, %v187_v28 }
  0xfe   :  { %v190_v30 = vpop.f32.mrf.mxu0 }
  0xff   :  { %637 = vmatmul.msk.f32.gmra.mxu1 %vm205_vm1, %v190_v30 }
 0x106   :  { %v192_v32 = vpop.f32.mrf.mxu0 }
 0x107   :  { %638 = vmatmul.msk.f32.gmra.mxu1 %vm205_vm1, %v192_v32 }
 0x10e   :  { %v195_v33 = vpop.f32.mrf.mxu0 }
 0x10f   :  { %639 = vmatmul.msk.f32.gmra.mxu1 %vm205_vm1, %v195_v33 }
 0x116   :  { %v197_v34 = vpop.f32.mrf.mxu0 }
 0x117   :  { %640 = vmatmul.msk.f32.gmra.mxu1 %vm205_vm1, %v197_v34 }
 0x11c   :  { %v275_v36 = vpop.f32.mrf.mxu1 }
 0x11d   :  { %v276_v37 = vadd.f32 %v786_v35, %v275_v36 }
 0x11f   :  { %v323_v38 = vmax.f32 %v276_v37, 0.0 }
 0x121   :  { %641 = vmatmul.msk.f32.vlgmr.msra.gmra.mxu2 %vm341_vm2, %v323_v38 }
 0x124   :  { %v278_v39 = vpop.f32.mrf.mxu1 }
 0x125   :  { %v279_v40 = vadd.f32 %v786_v35, %v278_v39  ;;  %v25_v39 = vld [vmem:[%s896_s0 + $0x8] sm:$0xff]  }
 0x127   :  { %v324_v41 = vmax.f32 %v279_v40, 0.0  ;;  %v457_v40 = vunpack.c.l.bf16 %v25_v39 }
 0x129   :  { %642 = vmatmul.msk.f32.gmra.mxu2 %vm341_vm2, %v324_v41  ;;  %v458_v41 = vunpack.c.h.bf16 %v25_v39 }
 0x12c   :  { %v281_v42 = vpop.f32.mrf.mxu1 }
 0x12d   :  { %v282_v43 = vadd.f32 %v786_v35, %v281_v42  ;;  %v27_v42 = vld [vmem:[%s896_s0 + $0x10] sm:$0xff]  }
 0x12f   :  { %v325_v44 = vmax.f32 %v282_v43, 0.0  ;;  %v459_v43 = vunpack.c.l.bf16 %v27_v42 }
 0x131   :  { %643 = vmatmul.msk.f32.gmra.mxu2 %vm341_vm2, %v325_v44  ;;  %v460_v44 = vunpack.c.h.bf16 %v27_v42 }
 0x134   :  { %v284_v45 = vpop.f32.mrf.mxu1 }
 0x135   :  { %v285_v46 = vadd.f32 %v786_v35, %v284_v45  ;;  %v29_v45 = vld [vmem:[%s896_s0 + $0x18] sm:$0xff]  }
 0x137   :  { %v326_v47 = vmax.f32 %v285_v46, 0.0  ;;  %v461_v46 = vunpack.c.l.bf16 %v29_v45 }
 0x139   :  { %644 = vmatmul.msk.f32.gmra.mxu2 %vm341_vm2, %v326_v47  ;;  %v462_v47 = vunpack.c.h.bf16 %v29_v45 }
 0x13c   :  { %v287_v48 = vpop.f32.mrf.mxu1 }
 0x13d   :  { %v288_v49 = vadd.f32 %v786_v35, %v287_v48  ;;  %v31_v48 = vld [vmem:[%s896_s0 + $0x20] sm:$0xff]  }
 0x13f   :  { %v327_v50 = vmax.f32 %v288_v49, 0.0  ;;  %v463_v49 = vunpack.c.l.bf16 %v31_v48 }
 0x141   :  { %645 = vmatmul.msk.f32.gmra.mxu2 %vm341_vm2, %v327_v50  ;;  %v464_v50 = vunpack.c.h.bf16 %v31_v48 }
 0x144   :  { %v290_v51 = vpop.f32.mrf.mxu1 }
 0x145   :  { %v291_v52 = vadd.f32 %v786_v35, %v290_v51  ;;  %v33_v51 = vld [vmem:[%s896_s0 + $0x28] sm:$0xff]  }
 0x147   :  { %v328_v53 = vmax.f32 %v291_v52, 0.0  ;;  %v465_v52 = vunpack.c.l.bf16 %v33_v51 }
 0x149   :  { %646 = vmatmul.msk.f32.gmra.mxu2 %vm341_vm2, %v328_v53  ;;  %v466_v53 = vunpack.c.h.bf16 %v33_v51 }
 0x14c   :  { %v293_v54 = vpop.f32.mrf.mxu1 }
 0x14d   :  { %v294_v55 = vadd.f32 %v786_v35, %v293_v54  ;;  %v35_v54 = vld [vmem:[%s896_s0 + $0x30] sm:$0xff]  }
 0x14f   :  { %v329_v56 = vmax.f32 %v294_v55, 0.0  ;;  %v467_v55 = vunpack.c.l.bf16 %v35_v54 }
 0x151   :  { %647 = vmatmul.msk.f32.gmra.mxu2 %vm341_vm2, %v329_v56  ;;  %v468_v56 = vunpack.c.h.bf16 %v35_v54 }
 0x154   :  { %v296_v57 = vpop.f32.mrf.mxu1 }
 0x155   :  { %v297_v58 = vadd.f32 %v786_v35, %v296_v57  ;;  %v37_v57 = vld [vmem:[%s896_s0 + $0x38] sm:$0xff]  }
 0x157   :  { %v330_v59 = vmax.f32 %v297_v58, 0.0  ;;  %v469_v58 = vunpack.c.l.bf16 %v37_v57 }
 0x159   :  { %648 = vmatmul.msk.f32.gmra.mxu2 %vm341_vm2, %v330_v59  ;;  %v470_v59 = vunpack.c.h.bf16 %v37_v57 }
 0x15c   :  { %v299_v60 = vpop.f32.mrf.mxu1 }
 0x15d   :  { %v300_v61 = vadd.f32 %v786_v35, %v299_v60  ;;  %v674_v60 = vld [vmem:[%s900_s5] ss:$0 sm:$0xff] }
 0x15f   :  { %v331_v62 = vmax.f32 %v300_v61, 0.0 }
 0x161   :  { %649 = vmatmul.msk.f32.gmra.mxu2 %vm341_vm2, %v331_v62 }
 0x164   :  { %v302_v63 = vpop.f32.mrf.mxu1 }
 0x165   :  { %v303_v0 = vadd.f32 %v786_v35, %v302_v63 }
 0x167   :  { %v332_v1 = vmax.f32 %v303_v0, 0.0 }
 0x169   :  { %650 = vmatmul.msk.f32.gmra.mxu2 %vm341_vm2, %v332_v1 }
 0x16c   :  { %v305_v2 = vpop.f32.mrf.mxu1 }
 0x16d   :  { %v306_v3 = vadd.f32 %v786_v35, %v305_v2 }
 0x16f   :  { %v333_v4 = vmax.f32 %v306_v3, 0.0 }
 0x171   :  { %651 = vmatmul.msk.f32.gmra.mxu2 %vm341_vm2, %v333_v4 }
 0x174   :  { %v308_v5 = vpop.f32.mrf.mxu1 }
 0x175   :  { %v309_v6 = vadd.f32 %v786_v35, %v308_v5 }
 0x177   :  { %v334_v7 = vmax.f32 %v309_v6, 0.0 }
 0x179   :  { %652 = vmatmul.msk.f32.gmra.mxu2 %vm341_vm2, %v334_v7 }
 0x17c   :  { %v311_v8 = vpop.f32.mrf.mxu1 }
 0x17d   :  { %v312_v9 = vadd.f32 %v786_v35, %v311_v8 }
 0x17f   :  { %v335_v10 = vmax.f32 %v312_v9, 0.0 }
 0x181   :  { %653 = vmatmul.msk.f32.gmra.mxu2 %vm341_vm2, %v335_v10 }
 0x184   :  { %v314_v11 = vpop.f32.mrf.mxu1 }
 0x185   :  { %v315_v12 = vadd.f32 %v786_v35, %v314_v11 }
 0x187   :  { %v336_v13 = vmax.f32 %v315_v12, 0.0 }
 0x189   :  { %654 = vmatmul.msk.f32.gmra.mxu2 %vm341_vm2, %v336_v13 }
 0x18c   :  { %v317_v14 = vpop.f32.mrf.mxu1 }
 0x18d   :  { %v318_v15 = vadd.f32 %v786_v35, %v317_v14 }
 0x18f   :  { %v337_v16 = vmax.f32 %v318_v15, 0.0 }
 0x191   :  { %655 = vmatmul.msk.f32.gmra.mxu2 %vm341_vm2, %v337_v16 }
 0x194   :  { %v320_v17 = vpop.f32.mrf.mxu1 }
 0x195   :  { %v321_v18 = vadd.f32 %v786_v35, %v320_v17  ;;  %v23_v35 = vld [vmem:[%s896_s0] sm:$0xff]  }
 0x196   :  { %v455_v37 = vunpack.c.l.bf16 %v23_v35  ;;  %v456_v38 = vunpack.c.h.bf16 %v23_v35 }
 0x197   :  { %v338_v19 = vmax.f32 %v321_v18, 0.0 }
 0x199   :  { %656 = vmatmul.msk.f32.gmra.mxu2 %vm341_vm2, %v338_v19 }
 0x1a4   :  { %v407_v20 = vpop.f32.mrf.mxu2 }
 0x1ac   :  { %v410_v21 = vpop.f32.mrf.mxu2 }
 0x1b4   :  { %v413_v22 = vpop.f32.mrf.mxu2 }
 0x1bc   :  { %v416_v23 = vpop.f32.mrf.mxu2 }
 0x1c4   :  { %v419_v24 = vpop.f32.mrf.mxu2 }
 0x1cc   :  { %v422_v25 = vpop.f32.mrf.mxu2 }
 0x1d4   :  { %v425_v26 = vpop.f32.mrf.mxu2 }
 0x1dc   :  { %v428_v27 = vpop.f32.mrf.mxu2 }
 0x1e4   :  { %v431_v28 = vpop.f32.mrf.mxu2 }
 0x1ec   :  { %v434_v29 = vpop.f32.mrf.mxu2 }
 0x1f4   :  { %v437_v30 = vpop.f32.mrf.mxu2 }
 0x1fc   :  { %v440_v31 = vpop.f32.mrf.mxu2 }
 0x204   :  { %v443_v32 = vpop.f32.mrf.mxu2 }
 0x20c   :  { %v446_v33 = vpop.f32.mrf.mxu2 }
 0x214   :  { %v449_v34 = vpop.f32.mrf.mxu2 }
 0x21c   :  { %v452_v36 = vpop.f32.mrf.mxu2 }
 0x21d   :  { %475 = vmatpush.msra.mxu3 %v452_v36 }
 0x21f   :  { %476 = vmatpush.msra.mxu3 %v449_v34 }
 0x221   :  { %477 = vmatpush.msra.mxu3 %v446_v33 }
 0x223   :  { %478 = vmatpush.msra.mxu3 %v443_v32 }
 0x225   :  { %479 = vmatpush.msra.mxu3 %v440_v31 }
 0x227   :  { %480 = vmatpush.msra.mxu3 %v437_v30 }
 0x229   :  { %481 = vmatpush.msra.mxu3 %v434_v29 }
 0x22b   :  { %482 = vmatpush.msra.mxu3 %v431_v28 }
 0x22d   :  { %483 = vmatpush.msra.mxu3 %v428_v27 }
 0x22f   :  { %484 = vmatpush.msra.mxu3 %v425_v26 }
 0x231   :  { %485 = vmatpush.msra.mxu3 %v422_v25 }
 0x233   :  { %486 = vmatpush.msra.mxu3 %v419_v24 }
 0x235   :  { %487 = vmatpush.msra.mxu3 %v416_v23 }
 0x237   :  { %488 = vmatpush.msra.mxu3 %v413_v22 }
 0x239   :  { %489 = vmatpush.msra.mxu3 %v410_v21 }
 0x23b   :  { %490 = vmatpush.msra.mxu3 %v407_v20 }
 0x23c   :  { %491 = vmatmul.f32.vlgmr.msra.gmra.mxu3 %v455_v37 }
 0x244   :  { %494 = vmatmul.f32.gmra.mxu3 %v456_v38 }
 0x24c   :  { %497 = vmatmul.f32.gmra.mxu3 %v457_v40 }
 0x254   :  { %500 = vmatmul.f32.gmra.mxu3 %v458_v41 }
 0x25c   :  { %503 = vmatmul.f32.gmra.mxu3 %v459_v43 }
 0x264   :  { %506 = vmatmul.f32.gmra.mxu3 %v460_v44 }
 0x26c   :  { %509 = vmatmul.f32.gmra.mxu3 %v461_v46 }
 0x274   :  { %512 = vmatmul.f32.gmra.mxu3 %v462_v47 }
 0x27c   :  { %515 = vmatmul.f32.gmra.mxu3 %v463_v49 }
 0x284   :  { %518 = vmatmul.f32.gmra.mxu3 %v464_v50 }
 0x28c   :  { %521 = vmatmul.f32.gmra.mxu3 %v465_v52 }
 0x294   :  { %524 = vmatmul.f32.gmra.mxu3 %v466_v53 }
 0x29c   :  { %527 = vmatmul.f32.gmra.mxu3 %v467_v55 }
 0x2a4   :  { %530 = vmatmul.f32.gmra.mxu3 %v468_v56 }
 0x2ac   :  { %533 = vmatmul.f32.gmra.mxu3 %v469_v58 }
 0x2b4   :  { %536 = vmatmul.f32.gmra.mxu3 %v470_v59 }
 0x2bf   :  { %v492_v61 = vpop.f32.mrf.mxu3 }
 0x2c0   :  { %v493_v62 = vadd.f32 %v674_v60, %v492_v61 }
 0x2c2   :  { %540 = vst [vmem:[%s901_s6] sm:$0xff] %v493_v62 }
 0x2c7   :  { %v495_v63 = vpop.f32.mrf.mxu3 }
 0x2c8   :  { %v496_v0 = vadd.f32 %v674_v60, %v495_v63 }
 0x2ca   :  { %541 = vst [vmem:[%s901_s6 + $0x8] sm:$0xff] %v496_v0 }
 0x2cf   :  { %v498_v1 = vpop.f32.mrf.mxu3 }
 0x2d0   :  { %v499_v2 = vadd.f32 %v674_v60, %v498_v1 }
 0x2d2   :  { %542 = vst [vmem:[%s901_s6 + $0x10] sm:$0xff] %v499_v2 }
 0x2d7   :  { %v501_v3 = vpop.f32.mrf.mxu3 }
 0x2d8   :  { %v502_v4 = vadd.f32 %v674_v60, %v501_v3 }
 0x2da   :  { %543 = vst [vmem:[%s901_s6 + $0x18] sm:$0xff] %v502_v4 }
 0x2df   :  { %v504_v5 = vpop.f32.mrf.mxu3 }
 0x2e0   :  { %v505_v6 = vadd.f32 %v674_v60, %v504_v5 }
 0x2e2   :  { %544 = vst [vmem:[%s901_s6 + $0x20] sm:$0xff] %v505_v6 }
 0x2e7   :  { %v507_v7 = vpop.f32.mrf.mxu3 }
 0x2e8   :  { %v508_v8 = vadd.f32 %v674_v60, %v507_v7 }
 0x2ea   :  { %545 = vst [vmem:[%s901_s6 + $0x28] sm:$0xff] %v508_v8 }
 0x2ef   :  { %v510_v9 = vpop.f32.mrf.mxu3 }
 0x2f0   :  { %v511_v10 = vadd.f32 %v674_v60, %v510_v9 }
 0x2f2   :  { %546 = vst [vmem:[%s901_s6 + $0x30] sm:$0xff] %v511_v10 }
 0x2f7   :  { %v513_v11 = vpop.f32.mrf.mxu3 }
 0x2f8   :  { %v514_v12 = vadd.f32 %v674_v60, %v513_v11 }
 0x2fa   :  { %547 = vst [vmem:[%s901_s6 + $0x38] sm:$0xff] %v514_v12 }
 0x2ff   :  { %v516_v13 = vpop.f32.mrf.mxu3 }
 0x300   :  { %v517_v14 = vadd.f32 %v674_v60, %v516_v13 }
 0x302   :  { %548 = vst [vmem:[%s901_s6 + $0x40] sm:$0xff] %v517_v14 }
 0x307   :  { %v519_v15 = vpop.f32.mrf.mxu3 }
 0x308   :  { %v520_v16 = vadd.f32 %v674_v60, %v519_v15 }
 0x30a   :  { %549 = vst [vmem:[%s901_s6 + $0x48] sm:$0xff] %v520_v16 }
 0x30f   :  { %v522_v17 = vpop.f32.mrf.mxu3 }
 0x310   :  { %v523_v18 = vadd.f32 %v674_v60, %v522_v17 }
 0x312   :  { %550 = vst [vmem:[%s901_s6 + $0x50] sm:$0xff] %v523_v18 }
 0x317   :  { %v525_v19 = vpop.f32.mrf.mxu3 }
 0x318   :  { %v526_v20 = vadd.f32 %v674_v60, %v525_v19 }
 0x31a   :  { %551 = vst [vmem:[%s901_s6 + $0x58] sm:$0xff] %v526_v20 }
 0x31f   :  { %v528_v21 = vpop.f32.mrf.mxu3 }
 0x320   :  { %v529_v22 = vadd.f32 %v674_v60, %v528_v21 }
 0x322   :  { %552 = vst [vmem:[%s901_s6 + $0x60] sm:$0xff] %v529_v22 }
 0x327   :  { %v531_v23 = vpop.f32.mrf.mxu3 }
 0x328   :  { %v532_v24 = vadd.f32 %v674_v60, %v531_v23 }
 0x32a   :  { %553 = vst [vmem:[%s901_s6 + $0x68] sm:$0xff] %v532_v24 }
 0x32f   :  { %v534_v25 = vpop.f32.mrf.mxu3 }
 0x330   :  { %v535_v26 = vadd.f32 %v674_v60, %v534_v25 }
 0x332   :  { %554 = vst [vmem:[%s901_s6 + $0x70] sm:$0xff] %v535_v26 }
 0x337   :  { %v537_v27 = vpop.f32.mrf.mxu3 }
 0x338   :  { %v538_v28 = vadd.f32 %v674_v60, %v537_v27 }
 0x33a   :  { %555 = vst [vmem:[%s901_s6 + $0x78] sm:$0xff] %v538_v28 }

</bundles_post_ra>
